<compile_context>
chip_gen: v6e
topology: v6e:2x2x1
jax: 0.10.0
libtpu: 0.0.40
codegen_flags: <defaults>
</compile_context>

<pallas_src>
import jax
import jax.numpy as jnp
from jax.experimental import pallas as pl
from jax.experimental.pallas import tpu as pltpu

DEFAULT_TILE_E = 2048           # target rows per grid step (multiple of 8)
VMEM_BUDGET = 36 * 1024 * 1024  # per-call working-set budget (v7x-safe)


def _round_up(x, m):
    return (x + m - 1) // m * m


def _pass2_vmem_estimate(tile_e, F, Hp, H):
    """Rough bytes for the pass-2 pipeline at a given row tile."""
    in_bufs = 2 * 2 * tile_e * F * 4          # src + dest tiles, double-buffered, f32
    out_bufs = 2 * tile_e * H * 4             # out tile, double-buffered, f32
    weights = 2 * (2 * F * Hp * 2 + Hp * H * 2 + 2 * Hp * 4 + H * 4)
    temps = 2 * tile_e * Hp * 4               # g (f32) + h temporary
    return in_bufs + out_bufs + weights + temps


# --------------------------------------------------------------- pass 1 -----
def _stats_kernel(src_ref, dest_ref, w1s_ref, w1d_ref, psum_ref, psumsq_ref):
    """g = src@W1s + dest@W1d (no bias); emit per-tile sum / sum-of-squares."""
    g = (jnp.dot(src_ref[...].astype(jnp.bfloat16), w1s_ref[...],
                 preferred_element_type=jnp.float32)
         + jnp.dot(dest_ref[...].astype(jnp.bfloat16), w1d_ref[...],
                   preferred_element_type=jnp.float32))                # [T, Hp] f32
    psum_ref[...] = jnp.sum(g, axis=0, keepdims=True)[None]           # [1, 1, Hp]
    psumsq_ref[...] = jnp.sum(g * g, axis=0, keepdims=True)[None]     # [1, 1, Hp]


# --------------------------------------------------------------- pass 2 -----
def _fused_kernel(src_ref, dest_ref, w1s_ref, w1d_ref, scale_ref, shift_ref,
                  w2_ref, b2_ref, out_ref):
    """out = ReLU((src@W1s + dest@W1d) * scale + shift) @ W2 + b2."""
    g = (jnp.dot(src_ref[...].astype(jnp.bfloat16), w1s_ref[...],
                 preferred_element_type=jnp.float32)
         + jnp.dot(dest_ref[...].astype(jnp.bfloat16), w1d_ref[...],
                   preferred_element_type=jnp.float32))                # [T, Hp] f32
    h = jnp.maximum(g * scale_ref[...] + shift_ref[...], 0.0)          # fused BN+ReLU
    out_ref[...] = (jnp.dot(h.astype(jnp.bfloat16), w2_ref[...],
                            preferred_element_type=jnp.float32)
                    + b2_ref[...])                                     # [T, H]


# --------------------------------------------------------------- wrapper ----
def _edge_block_impl(src, dest, params):
    """src, dest: [E, F] float32 -> [E, H] float32 (PyTorch EdgeBlock.forward).

    (edge_attr, u, batch of the PyTorch forward are unused by the module.)
    Assumes E >= 1 (training-mode BN over an empty batch is undefined).
    """
    E, F = src.shape
    H = params["w2"].shape[1]
    Hp = _round_up(H, 128)        # lane-dense hidden width (padded cols stay 0)

    # ---- row tiling: bounded padding waste, >= 2 tiles for v7x dual-TC ------
    n_tiles = max(pl.cdiv(E, DEFAULT_TILE_E), 2) if E >= 16 else 1
    tile_e = _round_up(pl.cdiv(E, n_tiles), 8)
    while tile_e > 256 and _pass2_vmem_estimate(tile_e, F, Hp, H) > VMEM_BUDGET:
        tile_e = _round_up(pl.cdiv(tile_e, 2), 8)
    E_pad = _round_up(E, tile_e)
    n_tiles = E_pad // tile_e
    pad_rows = E_pad - E

    # Inputs stay f32 in HBM (bf16 cast happens on-chip); pad rows only if needed.
    src_p = src if pad_rows == 0 else jnp.pad(src, ((0, pad_rows), (0, 0)))
    dest_p = dest if pad_rows == 0 else jnp.pad(dest, ((0, pad_rows), (0, 0)))

    # ---- parameter packing (tiny, once per call) -----------------------------
    w1s = jnp.pad(params["w1_src"], ((0, 0), (0, Hp - H))).astype(jnp.bfloat16)
    w1d = jnp.pad(params["w1_dest"], ((0, 0), (0, Hp - H))).astype(jnp.bfloat16)
    w2 = jnp.pad(params["w2"], ((0, Hp - H), (0, 0))).astype(jnp.bfloat16)   # [Hp, H]
    b2 = params["b2"].astype(jnp.float32)                                    # [1, H]
    gamma = jnp.pad(params["gamma"], ((0, 0), (0, Hp - H)), constant_values=1.0)
    beta = jnp.pad(params["beta"], ((0, 0), (0, Hp - H)))
    # NOTE: params["b1"] is NOT used: training-mode BatchNorm cancels it exactly.

    row_spec = pl.BlockSpec((tile_e, F), lambda i: (i, 0))
    w1_spec = pl.BlockSpec((F, Hp), lambda i: (0, 0))
    vec_hp = pl.BlockSpec((1, Hp), lambda i: (0, 0))

    est = _pass2_vmem_estimate(tile_e, F, Hp, H)
    vmem_limit = int(min(max(32 * 1024 * 1024, 2 * est), 48 * 1024 * 1024))
    compiler_params = pltpu.CompilerParams(
        dimension_semantics=("parallel",),
        vmem_limit_bytes=vmem_limit,
    )

    # ---- pass 1: per-tile partial BatchNorm statistics on g = x @ W1 --------
    psum, psumsq = pl.pallas_call(
        _stats_kernel,
        out_shape=(jax.ShapeDtypeStruct((n_tiles, 1, Hp), jnp.float32),
                   jax.ShapeDtypeStruct((n_tiles, 1, Hp), jnp.float32)),
        grid=(n_tiles,),
        in_specs=[row_spec, row_spec, w1_spec, w1_spec],
        out_specs=(pl.BlockSpec((1, 1, Hp), lambda i: (i, 0, 0)),
                   pl.BlockSpec((1, 1, Hp), lambda i: (i, 0, 0))),
        compiler_params=compiler_params,
        cost_estimate=pl.CostEstimate(
            flops=2 * E_pad * 2 * F * Hp,
            transcendentals=0,
            bytes_accessed=2 * E_pad * F * 4 + 2 * F * Hp * 2 * 2
                           + 2 * n_tiles * Hp * 4),
    )(src_p, dest_p, w1s, w1d)

    # ---- fold global stats into per-feature scale/shift (plain JAX, tiny) ----
    # Zero-padded rows contribute exactly 0 to both partials, so divide by E.
    total_sum = jnp.sum(psum[:, 0, :], axis=0)        # [Hp]
    total_sumsq = jnp.sum(psumsq[:, 0, :], axis=0)    # [Hp]
    mean_g = total_sum / E
    var_g = jnp.maximum(total_sumsq / E - mean_g * mean_g, 0.0)  # biased batch var
    inv = jax.lax.rsqrt(var_g + 1e-5)
    scale = (gamma[0] * inv)[None, :]                 # [1, Hp]
    shift = (beta[0] - mean_g * gamma[0] * inv)[None, :]  # [1, Hp] (b1 cancels)

    # ---- pass 2: recompute Linear1, fused BN + ReLU, Linear2 ------------------
    out_pad = pl.pallas_call(
        _fused_kernel,
        out_shape=jax.ShapeDtypeStruct((E_pad, H), jnp.float32),
        grid=(n_tiles,),
        in_specs=[row_spec, row_spec, w1_spec, w1_spec, vec_hp, vec_hp,
                  pl.BlockSpec((Hp, H), lambda i: (0, 0)),
                  pl.BlockSpec((1, H), lambda i: (0, 0))],
        out_specs=pl.BlockSpec((tile_e, H), lambda i: (i, 0)),
        compiler_params=compiler_params,
        cost_estimate=pl.CostEstimate(
            flops=2 * E_pad * (2 * F * Hp + Hp * H),
            transcendentals=0,
            bytes_accessed=2 * E_pad * F * 4 + E_pad * H * 4
                           + 2 * F * Hp * 2 * 2 + Hp * H * 2 + 12 * Hp + 4 * H),
    )(src_p, dest_p, w1s, w1d, scale, shift, w2, b2)

    return out_pad if pad_rows == 0 else out_pad[:E]


edge_block = jax.jit(_edge_block_impl)


# --------------------------------------------------------------- params -----
def init_params(key, inputs, hidden):
    """Deterministic init mimicking PyTorch Linear's U(-1/sqrt(fan_in), ...)."""
    k1, k2, k3, k4 = jax.random.split(key, 4)
    fan1 = 2 * inputs
    bound1 = 1.0 / jnp.sqrt(fan1)
    w1_t = jax.random.uniform(k1, (fan1, hidden), jnp.float32, -bound1, bound1)
    b1 = jax.random.uniform(k2, (1, hidden), jnp.float32, -bound1, bound1)
    bound2 = 1.0 / jnp.sqrt(hidden)
    w2_t = jax.random.uniform(k3, (hidden, hidden), jnp.float32, -bound2, bound2)
    b2 = jax.random.uniform(k4, (1, hidden), jnp.float32, -bound2, bound2)
    return {
        "w1_src": w1_t[:inputs, :],                     # [F, H]
        "w1_dest": w1_t[inputs:, :],                    # [F, H]
        "b1": b1,                                       # [1, H] (cancelled by BN)
        "gamma": jnp.ones((1, hidden), jnp.float32),    # BN weight init
        "beta": jnp.zeros((1, hidden), jnp.float32),    # BN bias init
        "w2": w2_t,                                     # [H, H]
        "b2": b2,                                       # [1, H]
    }


def edge_block_ref(src, dest, params):
    """Plain-JAX f32 reference matching the PyTorch module (training-mode BN)."""
    x = jnp.concatenate([src, dest], axis=1)
    w1 = jnp.concatenate([params["w1_src"], params["w1_dest"]], axis=0)
    h = x @ w1 + params["b1"]
    mean = jnp.mean(h, axis=0, keepdims=True)
    var = jnp.mean((h - mean) ** 2, axis=0, keepdims=True)
    h = (h - mean) / jnp.sqrt(var + 1e-5) * params["gamma"] + params["beta"]
    h = jnp.maximum(h, 0.0)
    return h @ params["w2"] + params["b2"]


if __name__ == "__main__":
    E, F, H = 64, 16, 32          # edges, input features, hidden size
    key = jax.random.PRNGKey(0)
    k_src, k_dest, k_param = jax.random.split(key, 3)

    src = jax.random.normal(k_src, (E, F), jnp.float32)
    dest = jax.random.normal(k_dest, (E, F), jnp.float32)
    params = init_params(k_param, F, H)

    out = jax.block_until_ready(edge_block(src, dest, params))
    ref = edge_block_ref(src, dest, params)

    assert out.shape == (E, H)
    assert bool(jnp.all(jnp.isfinite(out)))
    # bf16 matmul operands (f32 accumulation) => loosened tolerance vs f32 reference.
    assert jnp.allclose(out, ref, atol=5e-2, rtol=5e-2), (
        "mismatch vs reference, max abs diff = "
        f"{float(jnp.max(jnp.abs(out - ref)))}")

    print("KERNEL_OK")
</pallas_src>

<mosaic_0001>
module attributes {stable_mosaic.version = 11 : i64} {
  func.func @_stats_kernel(%arg0: i32, %arg1: memref<32x16xf32, #tpu.memory_space<vmem>>, %arg2: memref<32x16xf32, #tpu.memory_space<vmem>>, %arg3: memref<16x128xbf16, #tpu.memory_space<vmem>>, %arg4: memref<16x128xbf16, #tpu.memory_space<vmem>>, %arg5: memref<1x1x128xf32, #tpu.memory_space<vmem>>, %arg6: memref<1x1x128xf32, #tpu.memory_space<vmem>>) attributes {dimension_semantics = [#tpu.dimension_semantics<parallel>], iteration_bounds = array<i64: 2>, scalar_prefetch = 0 : i64, scratch_operands = 0 : i64, tpu.core_type = #tpu.core_type<tc>, window_params = [{transform_indices = @transform_0, window_bounds = array<i64: 32, 16>}, {transform_indices = @transform_1, window_bounds = array<i64: 32, 16>}, {pipeline_mode = #tpu.pipeline_mode<synchronous>, transform_indices = @transform_2, window_bounds = array<i64: 16, 128>}, {pipeline_mode = #tpu.pipeline_mode<synchronous>, transform_indices = @transform_3, window_bounds = array<i64: 16, 128>}, {transform_indices = @transform_4, window_bounds = array<i64: 1, 1, 128>}, {transform_indices = @transform_5, window_bounds = array<i64: 1, 1, 128>}]} {
    %c0 = arith.constant 0 : index
    %c0_0 = arith.constant 0 : index
    %0 = vector.load %arg1[%c0, %c0_0] : memref<32x16xf32, #tpu.memory_space<vmem>>, vector<32x16xf32>
    %1 = arith.truncf %0 : vector<32x16xf32> to vector<32x16xbf16>
    %c0_1 = arith.constant 0 : index
    %c0_2 = arith.constant 0 : index
    %2 = vector.load %arg3[%c0_1, %c0_2] : memref<16x128xbf16, #tpu.memory_space<vmem>>, vector<16x128xbf16>
    %cst = arith.constant dense<0.000000e+00> : vector<32x128xf32>
    %3 = tpu.matmul %1, %2, %cst {dimension_numbers = #tpu.dot_dimension_numbers<[1], [0], [0], [1], [0, 0, 1, 1], [], []>} : vector<32x16xbf16>, vector<16x128xbf16>, vector<32x128xf32> -> vector<32x128xf32>
    %c0_3 = arith.constant 0 : index
    %c0_4 = arith.constant 0 : index
    %4 = vector.load %arg2[%c0_3, %c0_4] : memref<32x16xf32, #tpu.memory_space<vmem>>, vector<32x16xf32>
    %5 = arith.truncf %4 : vector<32x16xf32> to vector<32x16xbf16>
    %c0_5 = arith.constant 0 : index
    %c0_6 = arith.constant 0 : index
    %6 = vector.load %arg4[%c0_5, %c0_6] : memref<16x128xbf16, #tpu.memory_space<vmem>>, vector<16x128xbf16>
    %cst_7 = arith.constant dense<0.000000e+00> : vector<32x128xf32>
    %7 = tpu.matmul %5, %6, %cst_7 {dimension_numbers = #tpu.dot_dimension_numbers<[1], [0], [0], [1], [0, 0, 1, 1], [], []>} : vector<32x16xbf16>, vector<16x128xbf16>, vector<32x128xf32> -> vector<32x128xf32>
    %8 = arith.addf %3, %7 : vector<32x128xf32>
    %cst_8 = arith.constant dense<0.000000e+00> : vector<128xf32>
    %9 = vector.multi_reduction <add>, %8, %cst_8 [0] : vector<32x128xf32> to vector<128xf32>
    %10 = vector.shape_cast %9 : vector<128xf32> to vector<1x128xf32>
    %11 = vector.shape_cast %10 : vector<1x128xf32> to vector<1x1x128xf32>
    %c0_9 = arith.constant 0 : index
    %c0_10 = arith.constant 0 : index
    %c0_11 = arith.constant 0 : index
    %12 = vector.load %arg5[%c0_9, %c0_10, %c0_11] : memref<1x1x128xf32, #tpu.memory_space<vmem>>, vector<1x1x128xf32>
    tpu.vector_store %arg5[%c0_9, %c0_10, %c0_11], %11 {strides = array<i32>} : memref<1x1x128xf32, #tpu.memory_space<vmem>>, vector<1x1x128xf32>,
    %13 = arith.mulf %8, %8 : vector<32x128xf32>
    %cst_12 = arith.constant dense<0.000000e+00> : vector<128xf32>
    %14 = vector.multi_reduction <add>, %13, %cst_12 [0] : vector<32x128xf32> to vector<128xf32>
    %15 = vector.shape_cast %14 : vector<128xf32> to vector<1x128xf32>
    %16 = vector.shape_cast %15 : vector<1x128xf32> to vector<1x1x128xf32>
    %c0_13 = arith.constant 0 : index
    %c0_14 = arith.constant 0 : index
    %c0_15 = arith.constant 0 : index
    %17 = vector.load %arg6[%c0_13, %c0_14, %c0_15] : memref<1x1x128xf32, #tpu.memory_space<vmem>>, vector<1x1x128xf32>
    tpu.vector_store %arg6[%c0_13, %c0_14, %c0_15], %16 {strides = array<i32>} : memref<1x1x128xf32, #tpu.memory_space<vmem>>, vector<1x1x128xf32>,
    return
  }
  func.func @transform_0(%arg0: i32) -> (i32, i32) {
    %c0_i32 = arith.constant 0 : i32
    %c0_i32_0 = arith.constant 0 : i32
    return %arg0, %c0_i32 : i32, i32
  }
  func.func @transform_1(%arg0: i32) -> (i32, i32) {
    %c0_i32 = arith.constant 0 : i32
    %c0_i32_0 = arith.constant 0 : i32
    return %arg0, %c0_i32 : i32, i32
  }
  func.func @transform_2(%arg0: i32) -> (i32, i32) {
    %c0_i32 = arith.constant 0 : i32
    %c0_i32_0 = arith.constant 0 : i32
    %c0_i32_1 = arith.constant 0 : i32
    return %c0_i32, %c0_i32_0 : i32, i32
  }
  func.func @transform_3(%arg0: i32) -> (i32, i32) {
    %c0_i32 = arith.constant 0 : i32
    %c0_i32_0 = arith.constant 0 : i32
    %c0_i32_1 = arith.constant 0 : i32
    return %c0_i32, %c0_i32_0 : i32, i32
  }
  func.func @transform_4(%arg0: i32) -> (i32, i32, i32) {
    %c0_i32 = arith.constant 0 : i32
    %c0_i32_0 = arith.constant 0 : i32
    %c0_i32_1 = arith.constant 0 : i32
    return %arg0, %c0_i32, %c0_i32_0 : i32, i32, i32
  }
  func.func @transform_5(%arg0: i32) -> (i32, i32, i32) {
    %c0_i32 = arith.constant 0 : i32
    %c0_i32_0 = arith.constant 0 : i32
    %c0_i32_1 = arith.constant 0 : i32
    return %arg0, %c0_i32, %c0_i32_0 : i32, i32, i32
  }
}

module attributes {stable_mosaic.version = 11 : i64} {
  func.func @_fused_kernel(%arg0: i32, %arg1: memref<32x16xf32, #tpu.memory_space<vmem>>, %arg2: memref<32x16xf32, #tpu.memory_space<vmem>>, %arg3: memref<16x128xbf16, #tpu.memory_space<vmem>>, %arg4: memref<16x128xbf16, #tpu.memory_space<vmem>>, %arg5: memref<1x128xf32, #tpu.memory_space<vmem>>, %arg6: memref<1x128xf32, #tpu.memory_space<vmem>>, %arg7: memref<128x32xbf16, #tpu.memory_space<vmem>>, %arg8: memref<1x32xf32, #tpu.memory_space<vmem>>, %arg9: memref<32x32xf32, #tpu.memory_space<vmem>>) attributes {dimension_semantics = [#tpu.dimension_semantics<parallel>], iteration_bounds = array<i64: 2>, scalar_prefetch = 0 : i64, scratch_operands = 0 : i64, tpu.core_type = #tpu.core_type<tc>, window_params = [{transform_indices = @transform_0, window_bounds = array<i64: 32, 16>}, {transform_indices = @transform_1, window_bounds = array<i64: 32, 16>}, {pipeline_mode = #tpu.pipeline_mode<synchronous>, transform_indices = @transform_2, window_bounds = array<i64: 16, 128>}, {pipeline_mode = #tpu.pipeline_mode<synchronous>, transform_indices = @transform_3, window_bounds = array<i64: 16, 128>}, {pipeline_mode = #tpu.pipeline_mode<synchronous>, transform_indices = @transform_4, window_bounds = array<i64: 1, 128>}, {pipeline_mode = #tpu.pipeline_mode<synchronous>, transform_indices = @transform_5, window_bounds = array<i64: 1, 128>}, {pipeline_mode = #tpu.pipeline_mode<synchronous>, transform_indices = @transform_6, window_bounds = array<i64: 128, 32>}, {pipeline_mode = #tpu.pipeline_mode<synchronous>, transform_indices = @transform_7, window_bounds = array<i64: 1, 32>}, {transform_indices = @transform_8, window_bounds = array<i64: 32, 32>}]} {
    %c0 = arith.constant 0 : index
    %c0_0 = arith.constant 0 : index
    %0 = vector.load %arg1[%c0, %c0_0] : memref<32x16xf32, #tpu.memory_space<vmem>>, vector<32x16xf32>
    %1 = arith.truncf %0 : vector<32x16xf32> to vector<32x16xbf16>
    %c0_1 = arith.constant 0 : index
    %c0_2 = arith.constant 0 : index
    %2 = vector.load %arg3[%c0_1, %c0_2] : memref<16x128xbf16, #tpu.memory_space<vmem>>, vector<16x128xbf16>
    %cst = arith.constant dense<0.000000e+00> : vector<32x128xf32>
    %3 = tpu.matmul %1, %2, %cst {dimension_numbers = #tpu.dot_dimension_numbers<[1], [0], [0], [1], [0, 0, 1, 1], [], []>} : vector<32x16xbf16>, vector<16x128xbf16>, vector<32x128xf32> -> vector<32x128xf32>
    %c0_3 = arith.constant 0 : index
    %c0_4 = arith.constant 0 : index
    %4 = vector.load %arg2[%c0_3, %c0_4] : memref<32x16xf32, #tpu.memory_space<vmem>>, vector<32x16xf32>
    %5 = arith.truncf %4 : vector<32x16xf32> to vector<32x16xbf16>
    %c0_5 = arith.constant 0 : index
    %c0_6 = arith.constant 0 : index
    %6 = vector.load %arg4[%c0_5, %c0_6] : memref<16x128xbf16, #tpu.memory_space<vmem>>, vector<16x128xbf16>
    %cst_7 = arith.constant dense<0.000000e+00> : vector<32x128xf32>
    %7 = tpu.matmul %5, %6, %cst_7 {dimension_numbers = #tpu.dot_dimension_numbers<[1], [0], [0], [1], [0, 0, 1, 1], [], []>} : vector<32x16xbf16>, vector<16x128xbf16>, vector<32x128xf32> -> vector<32x128xf32>
    %8 = arith.addf %3, %7 : vector<32x128xf32>
    %c0_8 = arith.constant 0 : index
    %c0_9 = arith.constant 0 : index
    %9 = vector.load %arg5[%c0_8, %c0_9] : memref<1x128xf32, #tpu.memory_space<vmem>>, vector<1x128xf32>
    %10 = vector.broadcast %9 : vector<1x128xf32> to vector<32x128xf32>
    %11 = arith.mulf %8, %10 : vector<32x128xf32>
    %c0_10 = arith.constant 0 : index
    %c0_11 = arith.constant 0 : index
    %12 = vector.load %arg6[%c0_10, %c0_11] : memref<1x128xf32, #tpu.memory_space<vmem>>, vector<1x128xf32>
    %13 = vector.broadcast %12 : vector<1x128xf32> to vector<32x128xf32>
    %14 = arith.addf %11, %13 : vector<32x128xf32>
    %cst_12 = arith.constant 0.000000e+00 : f32
    %15 = vector.broadcast %cst_12 : f32 to vector<32x128xf32>
    %16 = arith.maximumf %14, %15 : vector<32x128xf32>
    %17 = arith.truncf %16 : vector<32x128xf32> to vector<32x128xbf16>
    %c0_13 = arith.constant 0 : index
    %c0_14 = arith.constant 0 : index
    %18 = vector.load %arg7[%c0_13, %c0_14] : memref<128x32xbf16, #tpu.memory_space<vmem>>, vector<128x32xbf16>
    %cst_15 = arith.constant dense<0.000000e+00> : vector<32x32xf32>
    %19 = tpu.matmul %17, %18, %cst_15 {dimension_numbers = #tpu.dot_dimension_numbers<[1], [0], [0], [1], [0, 0, 1, 1], [], []>} : vector<32x128xbf16>, vector<128x32xbf16>, vector<32x32xf32> -> vector<32x32xf32>
    %c0_16 = arith.constant 0 : index
    %c0_17 = arith.constant 0 : index
    %20 = vector.load %arg8[%c0_16, %c0_17] : memref<1x32xf32, #tpu.memory_space<vmem>>, vector<1x32xf32>
    %21 = vector.broadcast %20 : vector<1x32xf32> to vector<32x32xf32>
    %22 = arith.addf %19, %21 : vector<32x32xf32>
    %c0_18 = arith.constant 0 : index
    %c0_19 = arith.constant 0 : index
    %23 = vector.load %arg9[%c0_18, %c0_19] : memref<32x32xf32, #tpu.memory_space<vmem>>, vector<32x32xf32>
    tpu.vector_store %arg9[%c0_18, %c0_19], %22 {strides = array<i32>} : memref<32x32xf32, #tpu.memory_space<vmem>>, vector<32x32xf32>,
    return
  }
  func.func @transform_0(%arg0: i32) -> (i32, i32) {
    %c0_i32 = arith.constant 0 : i32
    %c0_i32_0 = arith.constant 0 : i32
    return %arg0, %c0_i32 : i32, i32
  }
  func.func @transform_1(%arg0: i32) -> (i32, i32) {
    %c0_i32 = arith.constant 0 : i32
    %c0_i32_0 = arith.constant 0 : i32
    return %arg0, %c0_i32 : i32, i32
  }
  func.func @transform_2(%arg0: i32) -> (i32, i32) {
    %c0_i32 = arith.constant 0 : i32
    %c0_i32_0 = arith.constant 0 : i32
    %c0_i32_1 = arith.constant 0 : i32
    return %c0_i32, %c0_i32_0 : i32, i32
  }
  func.func @transform_3(%arg0: i32) -> (i32, i32) {
    %c0_i32 = arith.constant 0 : i32
    %c0_i32_0 = arith.constant 0 : i32
    %c0_i32_1 = arith.constant 0 : i32
    return %c0_i32, %c0_i32_0 : i32, i32
  }
  func.func @transform_4(%arg0: i32) -> (i32, i32) {
    %c0_i32 = arith.constant 0 : i32
    %c0_i32_0 = arith.constant 0 : i32
    %c0_i32_1 = arith.constant 0 : i32
    return %c0_i32, %c0_i32_0 : i32, i32
  }
  func.func @transform_5(%arg0: i32) -> (i32, i32) {
    %c0_i32 = arith.constant 0 : i32
    %c0_i32_0 = arith.constant 0 : i32
    %c0_i32_1 = arith.constant 0 : i32
    return %c0_i32, %c0_i32_0 : i32, i32
  }
  func.func @transform_6(%arg0: i32) -> (i32, i32) {
    %c0_i32 = arith.constant 0 : i32
    %c0_i32_0 = arith.constant 0 : i32
    %c0_i32_1 = arith.constant 0 : i32
    return %c0_i32, %c0_i32_0 : i32, i32
  }
  func.func @transform_7(%arg0: i32) -> (i32, i32) {
    %c0_i32 = arith.constant 0 : i32
    %c0_i32_0 = arith.constant 0 : i32
    %c0_i32_1 = arith.constant 0 : i32
    return %c0_i32, %c0_i32_0 : i32, i32
  }
  func.func @transform_8(%arg0: i32) -> (i32, i32) {
    %c0_i32 = arith.constant 0 : i32
    %c0_i32_0 = arith.constant 0 : i32
    return %arg0, %c0_i32 : i32, i32
  }
}

</mosaic_0001>

<bundles_post_ra>
// kernel: _edge_block_impl.2
= control target key start
LH: loop header
LB: loop body
LE: loop exit
PB: predicated region body
PF: predicated region fallthrough
CT: control target
= control target key end

     0   :  { %s585_s18 = smov 0   ;;  %s619_s0 = inlined_call_operand.vmem [shape: f32[64,16], index: 0, kind: input, shape index: {}]   ;;  %s620_s1 = inlined_call_operand.vmem [shape: f32[64,16], index: 1, kind: input, shape index: {}]   ;;  %s621_s2 = inlined_call_operand.vmem [shape: bf16[16,128], index: 2, kind: input, shape index: {}]   ;;  %s622_s3 = inlined_call_operand.vmem [shape: bf16[16,128], index: 3, kind: input, shape index: {}]   ;;  %s623_s4 = inlined_call_operand.vmem [shape: f32[2,1,128], index: 4, kind: output, shape index: {0}]   ;;  %s624_s5 = inlined_call_operand.vmem [shape: f32[2,1,128], index: 5, kind: output, shape index: {1}]  }
   0x1 LB: > { %s591_s19 = sadd.s32 4294967295, %s553_s18   ;;  %p506_p0 = scmp.ge.s32.totalorder %s553_s18, 1  ;;  %s553_s18 = sphi %s585_s18, %s16_s18  }
   0x2   : > { %p202_p1 = scmp.lt.s32.totalorder %s553_s18, 3 }
   0x4   : > { %p203_p2 = pnand %p506_p0, %p202_p1 }
   0x5   : > { %s507_s22 = sshll.u32 (!%p203_p2), %s591_s19, 2  ;;  %p248_p4 = scmp.lt.s32.totalorder (!%p203_p2), %s591_s19, 1 }
   0x6   : > { %206 = sbr.rel (%p203_p2) target bundleno = 241 (0xf1), region = 36  ;;  %p237_p3 = scmp.lt.s32.totalorder (!%p203_p2), %s507_s22, 7 }
   0xb   : > { %v545_v0 = vld [vmem:[%s622_s3] sm:$0xff]   ;;  %s626_s22 = smov (!%p237_p3, %s507_s22), 7  ;;  %vm277_vm0 = vcmask 130048   ;;  %s628_s19 = smov (!%p248_p4, %s591_s19), 1 }
   0xc   : > { %v546_v1 = vld [vmem:[%s621_s2] sm:$0xff]   ;;  %525 = vmatprep.subr.bf16.mxu0 %v545_v0  ;;  %s508_s25 = sshll.u32 %s626_s22, 3  ;;  %s250_s9 = scalar_lea.vmem %s623_s4, %s628_s19 }
   0xd   : > { %531 = vmatprep.subr.bf16.mxu1 %v546_v1  ;;  %526 = vmatpush3.bf16.msra.mxu0 %v545_v0  ;;  %s246_s28 = scalar_lea.vmem %s620_s1, %s508_s25  ;;  %s240_s6 = scalar_lea.vmem %s619_s0, %s508_s25 }
   0xe   : > { %532 = vmatpush3.bf16.msra.mxu1 %v546_v1  ;;  %v263_v2 = vld [vmem:[%s246_s28] sm:$0xff]  ;;  %v264_v3 = vld [vmem:[%s246_s28 + $0x8] sm:$0xff]  ;;  %v265_v7 = vld [vmem:[%s246_s28 + $0x10] sm:$0xff]  ;;  %s253_s12 = scalar_lea.vmem %s624_s5, %s628_s19 }
   0xf   : > { %v255_v4 = vld [vmem:[%s240_s6] sm:$0xff]  ;;  %v267_v5 = vpack.c.bf16 %v264_v3, %v263_v2  ;;  %v256_v6 = vld [vmem:[%s240_s6 + $0x8] sm:$0xff]  ;;  %v266_v8 = vld [vmem:[%s246_s28 + $0x18] sm:$0xff] }
  0x10   : > { %v259_v9 = vpack.c.bf16 %v256_v6, %v255_v4  ;;  %v268_v10 = vpack.c.bf16 %v266_v8, %v265_v7  ;;  %v257_v11 = vld [vmem:[%s240_s6 + $0x10] sm:$0xff]  ;;  %v258_v12 = vld [vmem:[%s240_s6 + $0x18] sm:$0xff] }
  0x11   : > { %527 = vmatprep.mubr.msk.bf16.mxu0 %vm277_vm0, %v267_v5  ;;  %v260_v13 = vpack.c.bf16 %v258_v12, %v257_v11 }
  0x12   : > { %533 = vmatprep.mubr.msk.bf16.mxu1 %vm277_vm0, %v259_v9  ;;  %528 = vmatmul.mubr.msk.bf16.vlgmr.msra.gmra.mxu0 %vm277_vm0, %v268_v10 }
  0x13   : > { %534 = vmatmul.mubr.msk.bf16.vlgmr.msra.gmra.mxu1 %vm277_vm0, %v260_v13 }
  0xd2   : > { %v529_v14 = vpop.f32.mrf.mxu0 }
  0xd3   : > { %v535_v15 = vpop.f32.mrf.mxu1 }
  0xd4   : > { %v318_v16 = vpop.f32.mrf.mxu0  ;;  %v388_v23 = vadd.f32 %v535_v15, %v529_v14 }
  0xd5   : > { %v379_v17 = vpop.f32.mrf.mxu1 }
  0xd6   : > { %v530_v18 = vpop.f32.mrf.mxu0  ;;  %v380_v20 = vadd.f32 %v379_v17, %v318_v16  ;;  %v406_v29 = vmul.f32 %v388_v23, %v388_v23 }
  0xd7   : > { %v536_v19 = vpop.f32.mrf.mxu1 }
  0xd8   : > { %v321_v21 = vpop.f32.mrf.mxu0  ;;  %v404_v25 = vmul.f32 %v380_v20, %v380_v20  ;;  %v391_v26 = vadd.f32 %v536_v19, %v530_v18 }
  0xd9   : > { %v382_v22 = vpop.f32.mrf.mxu1 }
  0xda   : > { %v383_v24 = vadd.f32 %v382_v22, %v321_v21  ;;  %v407_v32 = vmul.f32 %v391_v26, %v391_v26 }
  0xdc   : > { %v394_v27 = vadd.f32 %v383_v24, %v380_v20  ;;  %v405_v28 = vmul.f32 %v383_v24, %v383_v24 }
  0xde   : > { %v395_v30 = vadd.f32 %v394_v27, %v388_v23  ;;  %v408_v31 = vadd.f32 %v405_v28, %v404_v25 }
  0xe0   : > { %v396_v33 = vadd.f32 %v395_v30, %v391_v26  ;;  %v409_v34 = vadd.f32 %v408_v31, %v406_v29 }
  0xe2   : > { %v397_v35 = vrot.slane %v396_v33, 4  ;;  %v410_v36 = vadd.f32 %v409_v34, %v407_v32 }
  0xe4   : > { %v398_v37 = vadd.f32 %v397_v35, %v396_v33  ;;  %v411_v38 = vrot.slane %v410_v36, 4 }
  0xe6   : > { %v399_v39 = vrot.slane %v398_v37, 2  ;;  %v412_v40 = vadd.f32 %v411_v38, %v410_v36 }
  0xe8   : > { %v400_v41 = vadd.f32 %v399_v39, %v398_v37  ;;  %v413_v42 = vrot.slane %v412_v40, 2 }
  0xea   : > { %v401_v43 = vrot.slane %v400_v41, 1  ;;  %v414_v44 = vadd.f32 %v413_v42, %v412_v40 }
  0xec   : > { %v402_v45 = vadd.f32 %v401_v43, %v400_v41  ;;  %v415_v46 = vrot.slane %v414_v44, 1 }
  0xee   : > { %403 = vst [vmem:[%s250_s9] sm:$0x1] %v402_v45  ;;  %v416_v47 = vadd.f32 %v415_v46, %v414_v44 }
  0xf0   : > { %417 = vst [vmem:[%s253_s12] sm:$0x1] %v416_v47 }
  0xf1 PF: > { %s16_s18 = sadd.s32 1, %s553_s18  }
  0xf2   : > { %p13_p5 = scmp.ge.s32.totalorder %s16_s18, 4  }
  0xf4   :  { %15 = sbr.rel (!%p13_p5) target bundleno = 1 (0x1), region = 81 }

// kernel: _edge_block_impl.3
= control target key start
LH: loop header
LB: loop body
LE: loop exit
PB: predicated region body
PF: predicated region fallthrough
CT: control target
= control target key end

     0   :  { %s841_s27 = smov 0   ;;  %s909_s0 = inlined_call_operand.vmem [shape: f32[64,16], index: 0, kind: input, shape index: {}]   ;;  %s910_s1 = inlined_call_operand.vmem [shape: f32[64,16], index: 1, kind: input, shape index: {}]   ;;  %s911_s2 = inlined_call_operand.vmem [shape: bf16[16,128], index: 2, kind: input, shape index: {}]   ;;  %s912_s3 = inlined_call_operand.vmem [shape: bf16[16,128], index: 3, kind: input, shape index: {}]   ;;  %s913_s4 = inlined_call_operand.vmem [shape: f32[1,128], index: 4, kind: input, shape index: {}]   ;;  %s914_s5 = inlined_call_operand.vmem [shape: f32[1,128], index: 5, kind: input, shape index: {}]   ;;  %s915_s6 = inlined_call_operand.vmem [shape: bf16[128,32], index: 6, kind: input, shape index: {}]   ;;  %s916_s7 = inlined_call_operand.vmem [shape: f32[1,32], index: 7, kind: input, shape index: {}]   ;;  %s917_s8 = inlined_call_operand.vmem [shape: f32[64,32], index: 8, kind: output, shape index: {}]  }
   0x1 LB: > { %s692_s28 = sadd.s32 4294967295, %s794_s27   ;;  %p696_p0 = scmp.ge.s32.totalorder %s794_s27, 1  ;;  %s794_s27 = sphi %s841_s27, %s18_s27  }
   0x2   : > { %p274_p1 = scmp.lt.s32.totalorder %s794_s27, 3 }
   0x4   : > { %p275_p2 = pnand %p696_p0, %p274_p1 }
   0x5   : > { %s697_s9 = sshll.u32 (!%p275_p2), %s692_s28, 2 }
   0x6   : > { %278 = sbr.rel (%p275_p2) target bundleno = 438 (0x1b6), region = 52  ;;  %p314_p3 = scmp.lt.s32.totalorder (!%p275_p2), %s697_s9, 7 }
   0xb   : > { %v778_v0 = vld [vmem:[%s912_s3] sm:$0xff]   ;;  %s919_s9 = smov (!%p314_p3, %s697_s9), 7  ;;  %v780_v2 = vld [vmem:[%s915_s6 + $0x38] sm:$0xff]   ;;  %v781_v3 = vld [vmem:[%s915_s6 + $0x30] sm:$0xff]   ;;  %vm354_vm0 = vcmask 130048   ;;  %vm619_vm1 = vcmask 261120  }
   0xc   : > { %738 = vmatprep.subr.bf16.mxu1 %v778_v0  ;;  %v779_v1 = vld [vmem:[%s911_s2] sm:$0xff]   ;;  %s861_s16 = sshll.u32 %s919_s9, 3  ;;  %750 = vmatprep.subr.bf16.mxu0 %v780_v2  ;;  %v782_v16 = vld [vmem:[%s915_s6 + $0x28] sm:$0xff]   ;;  %v784_v18 = vld [vmem:[%s915_s6 + $0x18] sm:$0xff]  }
   0xd   : > { %739 = vmatpush3.bf16.msra.mxu1 %v778_v0  ;;  %s317_s19 = scalar_lea.vmem %s909_s0, %s861_s16  ;;  %s323_s22 = scalar_lea.vmem %s910_s1, %s861_s16  ;;  %751 = vmatpush3.bf16.msra.mxu0 %v780_v2  ;;  %v783_v17 = vld [vmem:[%s915_s6 + $0x20] sm:$0xff]   ;;  %v785_v19 = vld [vmem:[%s915_s6 + $0x10] sm:$0xff]   ;;  %v786_v20 = vld [vmem:[%s915_s6 + $0x8] sm:$0xff]  }
   0xe   : > { %744 = vmatprep.subr.bf16.mxu1 %v779_v1  ;;  %v340_v4 = vld [vmem:[%s323_s22] sm:$0xff]  ;;  %v341_v5 = vld [vmem:[%s323_s22 + $0x8] sm:$0xff]  ;;  %v342_v6 = vld [vmem:[%s323_s22 + $0x10] sm:$0xff]  ;;  %752 = vmatprep.subr.bf16.mxu0 %v781_v3  ;;  %s329_s23 = scalar_lea.vmem %s917_s8, %s861_s16 }
   0xf   : > { %v344_v7 = vpack.c.bf16 %v341_v5, %v340_v4  ;;  %v343_v8 = vld [vmem:[%s323_s22 + $0x18] sm:$0xff]  ;;  %v332_v9 = vld [vmem:[%s317_s19] sm:$0xff]  ;;  %v333_v10 = vld [vmem:[%s317_s19 + $0x8] sm:$0xff] }
  0x10   : > { %v345_v11 = vpack.c.bf16 %v343_v8, %v342_v6  ;;  %v336_v12 = vpack.c.bf16 %v333_v10, %v332_v9  ;;  %v334_v13 = vld [vmem:[%s317_s19 + $0x10] sm:$0xff]  ;;  %v335_v14 = vld [vmem:[%s317_s19 + $0x18] sm:$0xff]  ;;  %v787_v21 = vld [vmem:[%s915_s6] sm:$0xff]  }
  0x11   : > { %740 = vmatprep.mubr.msk.bf16.mxu1 %vm354_vm0, %v344_v7  ;;  %753 = vmatpush3.bf16.msra.mxu0 %v781_v3  ;;  %v337_v15 = vpack.c.bf16 %v335_v14, %v334_v13  ;;  %v709_v29 = vld [vmem:[%s913_s4] ss:$0 sm:$0xff] }
  0x12   : > { %741 = vmatmul.mubr.msk.bf16.vlgmr.msra.gmra.mxu1 %vm354_vm0, %v345_v11  ;;  %754 = vmatprep.subr.bf16.mxu0 %v782_v16  ;;  %v710_v36 = vld [vmem:[%s914_s5] ss:$0 sm:$0xff] }
  0x13   : > { %745 = vmatpush3.bf16.msra.mxu1 %v779_v1  ;;  %746 = vmatprep.mubr.msk.bf16.mxu1 %vm354_vm0, %v336_v12  ;;  %v711_v51 = vld [vmem:[%s916_s7] ss:$0 sm:$0xff] }
  0x15   : > { %755 = vmatpush3.bf16.msra.mxu0 %v782_v16 }
  0x16   : > { %756 = vmatprep.subr.bf16.mxu0 %v783_v17 }
  0x19   : > { %757 = vmatpush3.bf16.msra.mxu0 %v783_v17 }
  0x1a   : > { %747 = vmatmul.mubr.msk.bf16.vlgmr.msra.gmra.mxu1 %vm354_vm0, %v337_v15  ;;  %758 = vmatprep.subr.bf16.mxu0 %v784_v18 }
  0x1d   : > { %759 = vmatpush3.bf16.msra.mxu0 %v784_v18 }
  0x1e   : > { %760 = vmatprep.subr.bf16.mxu0 %v785_v19 }
  0x21   : > { %761 = vmatpush3.bf16.msra.mxu0 %v785_v19 }
  0x22   : > { %762 = vmatprep.subr.bf16.mxu0 %v786_v20 }
  0x25   : > { %763 = vmatpush3.bf16.msra.mxu0 %v786_v20 }
  0x26   : > { %764 = vmatprep.subr.bf16.mxu0 %v787_v21 }
  0x29   : > { %765 = vmatpush3.bf16.msra.mxu0 %v787_v21 }
  0xd2   : > { %v742_v22 = vpop.f32.mrf.mxu1 }
  0xd4   : > { %v395_v23 = vpop.f32.mrf.mxu1 }
  0xd6   : > { %v743_v24 = vpop.f32.mrf.mxu1 }
  0xd8   : > { %v398_v25 = vpop.f32.mrf.mxu1 }
  0xda   : > { %v748_v26 = vpop.f32.mrf.mxu1 }
  0xdb   : > { %v465_v27 = vadd.f32 %v748_v26, %v742_v22 }
  0xdc   : > { %v456_v28 = vpop.f32.mrf.mxu1 }
  0xdd   : > { %v457_v30 = vadd.f32 %v456_v28, %v395_v23  ;;  %v480_v34 = vmul.f32 %v709_v29, %v465_v27 }
  0xde   : > { %v749_v31 = vpop.f32.mrf.mxu1 }
  0xdf   : > { %v478_v32 = vmul.f32 %v709_v29, %v457_v30  ;;  %v468_v33 = vadd.f32 %v749_v31, %v743_v24  ;;  %v491_v42 = vadd.f32 %v710_v36, %v480_v34 }
  0xe0   : > { %v459_v35 = vpop.f32.mrf.mxu1 }
  0xe1   : > { %v481_v37 = vmul.f32 %v709_v29, %v468_v33  ;;  %v460_v38 = vadd.f32 %v459_v35, %v398_v25  ;;  %v489_v41 = vadd.f32 %v710_v36, %v478_v32  ;;  %v495_v47 = vmax.f32 %v491_v42, 0.0 }
  0xe3   : > { %v492_v39 = vadd.f32 %v710_v36, %v481_v37  ;;  %v479_v40 = vmul.f32 %v709_v29, %v460_v38  ;;  %v493_v45 = vmax.f32 %v489_v41, 0.0 }
  0xe5   : > { %v490_v43 = vadd.f32 %v710_v36, %v479_v40  ;;  %v496_v44 = vmax.f32 %v492_v39, 0.0 }
  0xe7   : > { %v494_v46 = vmax.f32 %v490_v43, 0.0  ;;  %v498_v49 = vpack.c.bf16 %v496_v44, %v495_v47 }
  0xe9   : > { %v497_v48 = vpack.c.bf16 %v494_v46, %v493_v45 }
  0xeb   : > { %766 = vmatprep.mubr.bf16.mxu0 %v497_v48 }
  0xec   : > { %767 = vmatmul.mubr.bf16.vlgmr.msra.gmra.mxu0 %v498_v49 }
 0x1ac   : > { %v768_v50 = vpop.f32.mrf.mxu0 }
 0x1ad   : > { %v613_v57 = vadd.f32 %v768_v50, %v711_v51 }
 0x1ae   : > { %v604_v52 = vpop.f32.mrf.mxu0 }
 0x1af   : > { %v605_v53 = vadd.f32 %v711_v51, %v604_v52  ;;  %622 = vst.msk [vmem:[%s329_s23 + $0x10] sm:$0xff] %vm619_vm1, %v613_v57 }
 0x1b0   : > { %v769_v54 = vpop.f32.mrf.mxu0 }
 0x1b1   : > { %620 = vst.msk [vmem:[%s329_s23] sm:$0xff] %vm619_vm1, %v605_v53  ;;  %v616_v58 = vadd.f32 %v769_v54, %v711_v51 }
 0x1b2   : > { %v607_v55 = vpop.f32.mrf.mxu0 }
 0x1b3   : > { %v608_v56 = vadd.f32 %v711_v51, %v607_v55  ;;  %623 = vst.msk [vmem:[%s329_s23 + $0x18] sm:$0xff] %vm619_vm1, %v616_v58 }
 0x1b5   : > { %621 = vst.msk [vmem:[%s329_s23 + $0x8] sm:$0xff] %vm619_vm1, %v608_v56 }
 0x1b6 PF: > { %s18_s27 = sadd.s32 1, %s794_s27  }
 0x1b7   : > { %p15_p4 = scmp.ge.s32.totalorder %s18_s27, 4  }
 0x1b9   :  { %17 = sbr.rel (!%p15_p4) target bundleno = 1 (0x1), region = 85 }

</bundles_post_ra>
